<compile_context>
chip_gen: v6e
topology: v6e:2x2x1
jax: 0.10.0
libtpu: 0.0.40
codegen_flags: <defaults>
</compile_context>

<pallas_src>
import functools
import math

import jax
import jax.numpy as jnp
from jax.experimental import pallas as pl
from jax.experimental.pallas import tpu as pltpu


_LANE = 128
_SUBLANE_32 = 8
# Soft per-grid-step budget (padded bytes, in-block + out-block, one buffer).
# The Pallas pipeline double-buffers both sides, so resident footprint is
# ~2x this (+ relayout scratch); 4 MiB keeps us in the measured 85%+-of-HBM
# roofline tile regime while comfortably fitting v7x's 64 MiB VMEM.
_BLOCK_BUDGET_BYTES = 4 * 1024 * 1024
_MIN_GRID_STEPS = 8


# ---------------------------------------------------------------------------
# Small helpers
# ---------------------------------------------------------------------------
def _round_up(x, m):
    return ((x + m - 1) // m) * m


def _sublane(dsize):
    # Sub-32-bit dtypes pack along sublanes (bf16 -> 16 rows, int8 -> 32).
    return _SUBLANE_32 * max(1, 4 // max(dsize, 1))


def _padded_block_bytes(shape, dsize):
    """VMEM footprint of one block buffer: last dim padded to 128 lanes,
    second-to-last padded to the dtype's sublane multiple."""
    s = list(shape)
    s[-1] = _round_up(s[-1], _LANE)
    if len(s) >= 2:
        s[-2] = _round_up(s[-2], _sublane(dsize))
    return math.prod(s) * dsize


@functools.lru_cache(maxsize=None)
def _vmem_ceiling_bytes():
    """Conservative per-core VMEM ceiling (headroom for Mosaic scratch)."""
    try:
        cap = int(pltpu.get_tpu_info().vmem_capacity_bytes)
    except Exception:
        cap = 64 * 1024 * 1024  # v7x has the smallest per-core VMEM
    return (cap // 4) * 3


def _compiler_params(block_bytes, n_grid_axes):
    ceiling = _vmem_ceiling_bytes()
    want = max(32 * 1024 * 1024, 4 * block_bytes)
    return pltpu.CompilerParams(
        dimension_semantics=("parallel",) * n_grid_axes,
        vmem_limit_bytes=int(min(want, ceiling)),
    )


def _cost(tensor_bytes):
    # Pure relayout: no flops, read + write the whole tensor once.
    return pl.CostEstimate(flops=0, transcendentals=0,
                           bytes_accessed=2 * int(tensor_bytes))


def _pick_lane_tile(dim, fits):
    """Largest multiple of 128 dividing `dim` that satisfies fits(tile)."""
    best = _LANE
    for t in range(_LANE, dim + 1, _LANE):
        if dim % t == 0 and fits(t):
            best = t
    return best


def _pick_batch_tile(batch, fits, steps_per_batch_block):
    """Largest divisor of `batch` whose block fits the budget, then shrunk so
    the grid keeps a few steps for pipelining / multi-core sharding."""
    divs = [d for d in range(1, batch + 1) if batch % d == 0]
    tb = 1
    for d in divs:
        if fits(d):
            tb = d
    while tb > 1 and (batch // tb) * steps_per_batch_block < _MIN_GRID_STEPS:
        tb = max(d for d in divs if d < tb)
    return tb


# ---------------------------------------------------------------------------
# Kernels
# ---------------------------------------------------------------------------
def _kernel_transpose3d(x_ref, o_ref):
    # (TB, A, C) -> (TB, C, A): pure XLU transpose, guaranteed to lower.
    o_ref[...] = jnp.transpose(x_ref[...], (0, 2, 1))


def _kernel_flat_out(x_ref, o_ref):
    # x_ref: (TB, P, TQ) lane-dense load; o_ref: (TB, TQ*P) lane-dense flat
    # slab of the transposed output memory image.
    t = jnp.transpose(x_ref[...], (0, 2, 1))      # (TB, TQ, P)
    o_ref[...] = t.reshape(o_ref.shape)           # interleave to memory order


def _kernel_flat_in(x_ref, o_ref):
    # x_ref: (TB, TP*Q) lane-dense flat slab of the input memory image;
    # o_ref: (TB, Q, TP) lane-dense store.
    tb, q, tp = o_ref.shape
    t = x_ref[...].reshape(tb, tp, q)             # de-interleave
    o_ref[...] = jnp.transpose(t, (0, 2, 1))


def _generic_permute_kernel(x_ref, o_ref, *, perm):
    o_ref[...] = jnp.transpose(x_ref[...], perm)


# ---------------------------------------------------------------------------
# pallas_call builders (shared by production and build-time probes)
# ---------------------------------------------------------------------------
def _build_flat_out(B, P, Q, tq, tb, dtype):
    dsize = jnp.dtype(dtype).itemsize
    bb = (_padded_block_bytes((tb, P, tq), dsize)
          + _padded_block_bytes((tb, tq * P), dsize))
    return pl.pallas_call(
        _kernel_flat_out,
        out_shape=jax.ShapeDtypeStruct((B, Q * P), dtype),
        grid_spec=pltpu.PrefetchScalarGridSpec(
            num_scalar_prefetch=0,
            grid=(B // tb, Q // tq),
            in_specs=[pl.BlockSpec((tb, P, tq), lambda b, qi: (b, 0, qi))],
            out_specs=pl.BlockSpec((tb, tq * P), lambda b, qi: (b, qi)),
        ),
        compiler_params=_compiler_params(bb, 2),
        cost_estimate=_cost(B * P * Q * dsize),
    )


def _build_flat_in(B, P, Q, tp, tb, dtype):
    dsize = jnp.dtype(dtype).itemsize
    bb = (_padded_block_bytes((tb, tp * Q), dsize)
          + _padded_block_bytes((tb, Q, tp), dsize))
    return pl.pallas_call(
        _kernel_flat_in,
        out_shape=jax.ShapeDtypeStruct((B, Q, P), dtype),
        grid_spec=pltpu.PrefetchScalarGridSpec(
            num_scalar_prefetch=0,
            grid=(B // tb, P // tp),
            in_specs=[pl.BlockSpec((tb, tp * Q), lambda b, pi: (b, pi))],
            out_specs=pl.BlockSpec((tb, Q, tp), lambda b, pi: (b, 0, pi)),
        ),
        compiler_params=_compiler_params(bb, 2),
        cost_estimate=_cost(B * P * Q * dsize),
    )


def _build_transpose3d(B, P, Q, tp, tq, tb, dtype):
    dsize = jnp.dtype(dtype).itemsize
    bb = (_padded_block_bytes((tb, tp, tq), dsize)
          + _padded_block_bytes((tb, tq, tp), dsize))
    return pl.pallas_call(
        _kernel_transpose3d,
        out_shape=jax.ShapeDtypeStruct((B, Q, P), dtype),
        grid_spec=pltpu.PrefetchScalarGridSpec(
            num_scalar_prefetch=0,
            grid=(B // tb, P // tp, Q // tq),
            in_specs=[pl.BlockSpec((tb, tp, tq), lambda b, pi, qi: (b, pi, qi))],
            out_specs=pl.BlockSpec((tb, tq, tp), lambda b, pi, qi: (b, qi, pi)),
        ),
        compiler_params=_compiler_params(bb, 3),
        cost_estimate=_cost(B * P * Q * dsize),
    )


# ---------------------------------------------------------------------------
# Build-time probes: statically decide whether the in-kernel relayout of the
# flat-slab paths lowers for this block shape (no try/except around the
# production pallas_call; a rejected relayout selects the proven fallback).
# ---------------------------------------------------------------------------
@functools.lru_cache(maxsize=None)
def _flat_out_lowers(P, tq, tb, dtype_name):
    dtype = jnp.dtype(dtype_name)
    try:
        call = _build_flat_out(tb, P, tq, tq, tb, dtype)
        jax.jit(call).lower(jax.ShapeDtypeStruct((tb, P, tq), dtype)).compile()
        return True
    except Exception:
        return False


@functools.lru_cache(maxsize=None)
def _flat_in_lowers(tp, Q, tb, dtype_name):
    dtype = jnp.dtype(dtype_name)
    try:
        call = _build_flat_in(tb, tp, Q, tp, tb, dtype)
        jax.jit(call).lower(jax.ShapeDtypeStruct((tb, tp * Q), dtype)).compile()
        return True
    except Exception:
        return False


# ---------------------------------------------------------------------------
# Batched 2D transpose: (B, P, Q) -> (B, Q, P)
# ---------------------------------------------------------------------------
def _batched_transpose(x3):
    B, P, Q = x3.shape
    dtype = x3.dtype
    dsize = dtype.itemsize
    dname = jnp.dtype(dtype).name
    p_aligned = P % _LANE == 0
    q_aligned = Q % _LANE == 0

    if p_aligned and q_aligned:
        # Both sides tile lane-dense: pure 3D transpose blocks.
        def fits(tp, tq, tb=1):
            return (_padded_block_bytes((tb, tp, tq), dsize)
                    + _padded_block_bytes((tb, tq, tp), dsize)) <= _BLOCK_BUDGET_BYTES
        tq = _pick_lane_tile(Q, lambda t: fits(_LANE, t))
        tp = _pick_lane_tile(P, lambda t: fits(t, tq))
        tb = _pick_batch_tile(B, lambda d: fits(tp, tq, d), (P // tp) * (Q // tq))
        return _build_transpose3d(B, P, Q, tp, tq, tb, dtype)(x3)

    if p_aligned:
        # Input last dim Q is lane-narrow / unaligned: read lane-dense flat
        # rows of the input image and de-interleave in-kernel (flat-in trick).
        def fits(tp, tb=1):
            return (_padded_block_bytes((tb, tp * Q), dsize)
                    + _padded_block_bytes((tb, Q, tp), dsize)) <= _BLOCK_BUDGET_BYTES
        tp = _pick_lane_tile(P, fits)
        tb = _pick_batch_tile(B, lambda d: fits(tp, d), P // tp)
        if _flat_in_lowers(tp, Q, tb, dname):
            x2 = x3.reshape(B, P * Q)          # free, contiguous view
            return _build_flat_in(B, P, Q, tp, tb, dtype)(x2)
        # Fallback (always lowers): lane-narrow loads, lane-dense stores.
        return _build_transpose3d(B, P, Q, tp, Q, tb, dtype)(x3)

    if q_aligned:
        # Output last dim P is lane-narrow / unaligned: transpose and write a
        # lane-dense flat slab of the output image (flat-out trick).
        def fits(tq, tb=1):
            return (_padded_block_bytes((tb, P, tq), dsize)
                    + _padded_block_bytes((tb, tq * P), dsize)) <= _BLOCK_BUDGET_BYTES
        tq = _pick_lane_tile(Q, fits)
        tb = _pick_batch_tile(B, lambda d: fits(tq, d), Q // tq)
        if _flat_out_lowers(P, tq, tb, dname):
            flat = _build_flat_out(B, P, Q, tq, tb, dtype)(x3)
            return flat.reshape(B, Q, P)       # free, contiguous view
        # Fallback (always lowers): lane-dense loads, masked narrow stores.
        return _build_transpose3d(B, P, Q, P, tq, tb, dtype)(x3)

    # Neither trailing extent is 128-aligned (e.g. C=96, H*W=56*56): process
    # whole (TB, P, Q) slabs; full-extent block dims are always legal.
    def block_bytes(tb):
        return (_padded_block_bytes((tb, P, Q), dsize)
                + _padded_block_bytes((tb, Q * P), dsize))
    if block_bytes(1) > _vmem_ceiling_bytes() // 3:
        # TODO(synk): tile the sublane axis for huge both-unaligned shapes;
        # VSSBlock's permutes never reach this.
        raise NotImplementedError(
            "pallas_permute: per-batch slab too large for VMEM and neither "
            "trailing extent is a multiple of 128")
    budget = max(_BLOCK_BUDGET_BYTES, block_bytes(1))
    tb = _pick_batch_tile(B, lambda d: block_bytes(d) <= budget, 1)
    if _flat_out_lowers(P, Q, tb, dname):
        flat = _build_flat_out(B, P, Q, Q, tb, dtype)(x3)
        return flat.reshape(B, Q, P)
    return _build_transpose3d(B, P, Q, P, Q, tb, dtype)(x3)


# ---------------------------------------------------------------------------
# Generic fallback (trailing permutation that is not a rotation)
# ---------------------------------------------------------------------------
def _generic_permute(x, perm):
    # TODO(synk): whole-slab, not lane-optimized / not tiled; VSSBlock's
    # permutes are rotations and never reach this path.
    b = x.shape[0]
    out_shape = tuple(x.shape[p] for p in perm)
    dsize = x.dtype.itemsize
    bb = (_padded_block_bytes((1,) + tuple(x.shape[1:]), dsize)
          + _padded_block_bytes((1,) + out_shape[1:], dsize))
    if bb > _vmem_ceiling_bytes() // 3:
        raise NotImplementedError(
            "pallas_permute: non-rotation permute slab too large for VMEM")
    n_trailing = x.ndim - 1
    kernel = functools.partial(_generic_permute_kernel, perm=perm)
    return pl.pallas_call(
        kernel,
        out_shape=jax.ShapeDtypeStruct(out_shape, x.dtype),
        grid_spec=pltpu.PrefetchScalarGridSpec(
            num_scalar_prefetch=0,
            grid=(b,),
            in_specs=[pl.BlockSpec((1,) + tuple(x.shape[1:]),
                                   lambda i: (i,) + (0,) * n_trailing)],
            out_specs=pl.BlockSpec((1,) + out_shape[1:],
                                   lambda i: (i,) + (0,) * n_trailing),
        ),
        compiler_params=_compiler_params(bb, 1),
        cost_estimate=_cost(x.size * dsize),
    )(x)


# ---------------------------------------------------------------------------
# Public wrapper: torch.Tensor.permute(*perm)
# ---------------------------------------------------------------------------
def _find_rotation_split(perm):
    n = len(perm)
    dims = list(range(n))
    for k in range(1, n):
        if list(perm) == dims[k:] + dims[:k]:
            return k
    return None


def pallas_permute(x: jax.Array, perm) -> jax.Array:
    """Forward pass of the VSSBlock `Permute` module: x.permute(*perm)."""
    perm = tuple(int(p) for p in perm)
    ndim = x.ndim
    assert len(perm) == ndim and sorted(perm) == list(range(ndim))

    if perm == tuple(range(ndim)):
        return x  # identity permute (torch returns a view)

    out_shape = tuple(x.shape[p] for p in perm)

    if perm[0] == 0:
        # Cyclic rotation of the trailing axes (covers (0,2,3,1)/(0,3,1,2)):
        # a batched 2D transpose between two free contiguous reshapes.
        tail = tuple(p - 1 for p in perm[1:])
        split = _find_rotation_split(tail)
        if split is not None:
            b = x.shape[0]
            p_size = math.prod(x.shape[1:1 + split])
            q_size = math.prod(x.shape[1 + split:])
            x3 = x.reshape(b, p_size, q_size)
            return _batched_transpose(x3).reshape(out_shape)
        return _generic_permute(x, perm)

    # Leading axis moves: a rotation of *all* axes is a single 2D transpose.
    split = _find_rotation_split(perm)
    if split is not None:
        p_size = math.prod(x.shape[:split])
        q_size = math.prod(x.shape[split:])
        x3 = x.reshape(1, p_size, q_size)
        return _batched_transpose(x3).reshape(out_shape)

    # TODO(synk): general permutations that move the leading axis need a
    # different grid/BlockSpec mapping; VSSBlock never does this.
    raise NotImplementedError("pallas_permute: unsupported permutation %s" % (perm,))


if __name__ == "__main__":
    key = jax.random.PRNGKey(0)
    # Small NCHW input consistent with how Permute is used in VSSBlock.
    B, C, H, W = 2, 4, 16, 16
    x = jax.random.normal(key, (B, C, H, W), dtype=jnp.float32)

    # NCHW -> NHWC, as in Permute(0, 2, 3, 1)
    y = jax.block_until_ready(pallas_permute(x, (0, 2, 3, 1)))
    y_ref = jnp.transpose(x, (0, 2, 3, 1))
    assert y.shape == y_ref.shape, (y.shape, y_ref.shape)
    assert y.dtype == y_ref.dtype
    assert bool(jnp.array_equal(y, y_ref)), "Pallas permute mismatch"

    # NHWC -> NCHW, as in Permute(0, 3, 1, 2): must round-trip exactly.
    z = jax.block_until_ready(pallas_permute(y, (0, 3, 1, 2)))
    z_ref = jnp.transpose(y, (0, 3, 1, 2))
    assert bool(jnp.array_equal(z, z_ref)), "Pallas inverse permute mismatch"
    assert bool(jnp.array_equal(z, x)), "Pallas round-trip mismatch"

    print("KERNEL_OK")
</pallas_src>

<mosaic_0001>
module attributes {stable_mosaic.version = 11 : i64} {
  func.func @_kernel_transpose3d(%arg0: i32, %arg1: i32, %arg2: i32, %arg3: memref<1x4x256xf32, #tpu.memory_space<vmem>>, %arg4: memref<1x256x4xf32, #tpu.memory_space<vmem>>) attributes {dimension_semantics = [#tpu.dimension_semantics<parallel>, #tpu.dimension_semantics<parallel>, #tpu.dimension_semantics<parallel>], iteration_bounds = array<i64: 2, 1, 1>, scalar_prefetch = 0 : i64, scratch_operands = 0 : i64, tpu.core_type = #tpu.core_type<tc>, window_params = [{transform_indices = @transform_0, window_bounds = array<i64: 1, 4, 256>}, {transform_indices = @transform_1, window_bounds = array<i64: 1, 256, 4>}]} {
    %c0 = arith.constant 0 : index
    %c0_0 = arith.constant 0 : index
    %c0_1 = arith.constant 0 : index
    %0 = vector.load %arg3[%c0, %c0_0, %c0_1] : memref<1x4x256xf32, #tpu.memory_space<vmem>>, vector<1x4x256xf32>
    %1 = tpu.transpose %0, [0, 2, 1] : vector<1x4x256xf32> -> vector<1x256x4xf32>
    %c0_2 = arith.constant 0 : index
    %c0_3 = arith.constant 0 : index
    %c0_4 = arith.constant 0 : index
    %2 = vector.load %arg4[%c0_2, %c0_3, %c0_4] : memref<1x256x4xf32, #tpu.memory_space<vmem>>, vector<1x256x4xf32>
    tpu.vector_store %arg4[%c0_2, %c0_3, %c0_4], %1 {strides = array<i32>} : memref<1x256x4xf32, #tpu.memory_space<vmem>>, vector<1x256x4xf32>,
    return
  }
  func.func @transform_0(%arg0: i32, %arg1: i32, %arg2: i32) -> (i32, i32, i32) {
    %c0_i32 = arith.constant 0 : i32
    return %arg0, %arg1, %arg2 : i32, i32, i32
  }
  func.func @transform_1(%arg0: i32, %arg1: i32, %arg2: i32) -> (i32, i32, i32) {
    %c0_i32 = arith.constant 0 : i32
    return %arg0, %arg2, %arg1 : i32, i32, i32
  }
}

</mosaic_0001>

<bundles_post_ra>
// kernel: tpu_custom_call.1
= control target key start
LH: loop header
LB: loop body
LE: loop exit
PB: predicated region body
PF: predicated region fallthrough
CT: control target
= control target key end

     0   :  { %6 = vsyncpa [#allocation3], 0  ;;  %s722_s0 = inlined_call_operand.hbm [shape: f32[2,4,256], index: 0, kind: input, shape index: {}]   ;;  %s723_s1 = inlined_call_operand.vmem [shape: f32[2,256,4], index: 1, kind: output, shape index: {}]  }
   0x1   :  { %8 = vsyncpa [#allocation3 + $0x1], 0  ;;  %s556_s6 = smov 0   ;;  %s558_s7 = smov 0  }
   0x2   :  { %s560_s8 = smov 0   ;;  %s562_s9 = smov 0  }
   0x3   :  { %s564_s10 = smov 0   ;;  %s566_s11 = smov 0  }
   0x4 LB: > { %s393_s12 = sadd.s32 4294967295, %s543_s11   ;;  %s33_s13 = sadd.s32 1, %s539_s10  ;;  %s543_s11 = sphi %s566_s11, %s14_s11   ;;  %s539_s10 = sphi %s564_s10, %s731_s10   ;;  %s535_s9 = sphi %s562_s9, %s730_s9   ;;  %s531_s8 = sphi %s560_s8, %s729_s8   ;;  %s527_s7 = sphi %s558_s7, %s728_s7   ;;  %s523_s6 = sphi %s556_s6, %s727_s6  }
   0x5   : > { %p35_p0 = scmp.ge.s32.totalorder %s33_s13, 2  ;;  %s44_s14 = sadd.s32 1, %s531_s8 }
   0x6   : > { %p51_p1 = scmp.ne.s32.totalorder %s531_s8, %s527_s7  ;;  %p52_p2 = scmp.eq.s32.totalorder %s543_s11, 0 }
   0x7   : > { %s733_s13 = smov (%p35_p0, %s33_s13), 0  ;;  %p57_p4 = scmp.ne.s32.totalorder %s527_s7, %s523_s6 }
   0x8   : > { %p592_p3 = por %p52_p2, %p51_p1  ;;  %s37_s16 = ssub.s32 %s539_s10, %s733_s13 }
   0x9   : > { %p58_p5 = scmp.eq.s32.totalorder %s393_s12, 0  ;;  %p42_p6 = scmp.eq.s32.totalorder %s37_s16, 0 }
   0xa   : > { %p414_p8 = scmp.lt.s32.totalorder %s543_s11, 2  ;;  %s111_s19 = sand.u32 1, %s531_s8  }
   0xb   : > { %p599_p7 = por %p58_p5, %p57_p4  ;;  %s406_s20 = sshll.u32 %s539_s10, 7 }
   0xc   : > { %s605_s18 = scalar_select %p42_p6, %s531_s8, %s44_s14  }
   0xd   : > { %s397_s21 = sshll.u32 %s111_s19, 3  ;;  %s125_s24 = scalar_lea.hbm %s722_s0, %s406_s20 }
   0xe   : > { %s115_s25 = scalar_lea.vmem [#allocation2], %s397_s21  ;;  %p614_p9 = pnand %p414_p8, %p592_p3 }
   0xf   : > { %s127_s26 = sshll.u32 %s115_s25, 4  ;;  %p400_p10 = scmp.ge.s32.totalorder %s543_s11, 1  ;;  %s128_s26 = int_to_ptr.vmem [resolvable:$true] %s127_s26 }
  0x10   : > { %p132_p11 = scmp.lt.s32.totalorder %s543_s11, 3  ;;  %s112_s28 = scalar_lea.sflag [#allocation3], %s111_s19 }
  0x11   : > { %p467_p12 = pneg %p614_p9  ;;  %s478_s29 = scalar_lea.vmem %s128_s26, 128 }
  0x12   : > { %p479_p13 = scmp.ne.s32.totalorder %s128_s26, %s478_s29  ;;  %s545_s30 = smov [#allocation2]  }
  0x13   : > { %s483_s2 = sshll.u32 %s545_s30, 4  ;;  %s484_s2 = int_to_ptr.vmem [resolvable:$false] %s483_s2 }
  0x14   : > { %p481_p0 = pnand %p479_p13, %p467_p12  ;;  %s485_s3 = scalar_lea.vmem %s484_s2, 256 }
  0x15   : > { %p486_p2 = scmp.lt.s32.totalorder %s128_s26, %s484_s2  ;;  %p487_p3 = scmp.lt.s32.totalorder %s485_s3, %s478_s29 }
  0x16   : > { %p482_p1 = pneg %p481_p0 }
  0x17   : > { %p488_p4 = por %p487_p3, %p486_p2 }
  0x19   : > { %p489_p5 = pnand %p488_p4, %p482_p1 }
  0x1b   : > { %492 = shalt.err (!%p489_p5)
}
  0x1c   : > { %413 = dma.hbm_to_vmem [thread:$0]  (!%p614_p9), %s125_s24, 128, %s128_s26, %s112_s28  }
  0x1d   : > { %p133_p6 = pnand %p400_p10, %p132_p11 }
  0x1e   : > { %s138_s4 = sand.u32 (!%p133_p6), 1, %s527_s7  }
  0x1f   : > { %136 = sbr.rel (%p133_p6) target bundleno = 288 (0x120), region = 24  ;;  %s401_s5 = sshll.u32 (!%p133_p6), %s138_s4, 3 }
  0x20   : > { %s139_s6 = scalar_lea.sflag (!%p133_p6), [#allocation3], %s138_s4  ;;  %s142_s12 = scalar_lea.vmem (!%p133_p6), [#allocation2], %s401_s5 }
  0x24   : > { %518 = dma.done.wait (%p599_p7), %s139_s6, 128  }
  0x25   : > { %520 = vsyncadd (%p599_p7), %s139_s6, 4294967168  ;;  %v182_v0 = vld [vmem:[%s142_s12] sm:$0xff]  ;;  %p170_p8 = scmp.lt.s32.totalorder %s535_s9, 1  ;;  %vm250_vm0 = vcmask 31744  }
  0x26   : > { %186 = vxpose.xlu0.b32.start.end [1/1] (short) %v182_v0, 128  ;;  %v184_v1 = vcombine.high %v182_v0, %v182_v0 }
  0x27   : > { %s735_s9 = smov (!%p170_p8, %s535_s9), 1 }
  0x28   : > { %s407_s14 = sshll.u32 %s735_s9, 8 }
  0x29   : > { %s638_s19 = scalar_lea.vmem %s723_s1, %s407_s14 }
  0x63   : > { %218 = vxpose.xlu0.b32.start.end [1/1] (short) %v184_v1, 128 }
  0xa2   : > { %v202_v2 = vpop.trf.xlu0 }
  0xa3   : > { %251 = vst.msk [vmem:[%s638_s19] sm:$0xff] %vm250_vm0, %v202_v2 }
  0xa6   : > { %v203_v3 = vpop.trf.xlu0 }
  0xa7   : > { %252 = vst.msk [vmem:[%s638_s19 + $0x8] sm:$0xff] %vm250_vm0, %v203_v3 }
  0xaa   : > { %v204_v4 = vpop.trf.xlu0 }
  0xab   : > { %253 = vst.msk [vmem:[%s638_s19 + $0x10] sm:$0xff] %vm250_vm0, %v204_v4 }
  0xae   : > { %v205_v5 = vpop.trf.xlu0 }
  0xaf   : > { %254 = vst.msk [vmem:[%s638_s19 + $0x18] sm:$0xff] %vm250_vm0, %v205_v5 }
  0xb2   : > { %v206_v6 = vpop.trf.xlu0 }
  0xb3   : > { %255 = vst.msk [vmem:[%s638_s19 + $0x20] sm:$0xff] %vm250_vm0, %v206_v6 }
  0xb6   : > { %v207_v7 = vpop.trf.xlu0 }
  0xb7   : > { %256 = vst.msk [vmem:[%s638_s19 + $0x28] sm:$0xff] %vm250_vm0, %v207_v7 }
  0xba   : > { %v208_v8 = vpop.trf.xlu0 }
  0xbb   : > { %257 = vst.msk [vmem:[%s638_s19 + $0x30] sm:$0xff] %vm250_vm0, %v208_v8 }
  0xbe   : > { %v209_v9 = vpop.trf.xlu0 }
  0xbf   : > { %258 = vst.msk [vmem:[%s638_s19 + $0x38] sm:$0xff] %vm250_vm0, %v209_v9 }
  0xc2   : > { %v210_v10 = vpop.trf.xlu0 }
  0xc3   : > { %259 = vst.msk [vmem:[%s638_s19 + $0x40] sm:$0xff] %vm250_vm0, %v210_v10 }
  0xc6   : > { %v211_v11 = vpop.trf.xlu0 }
  0xc7   : > { %260 = vst.msk [vmem:[%s638_s19 + $0x48] sm:$0xff] %vm250_vm0, %v211_v11 }
  0xca   : > { %v212_v12 = vpop.trf.xlu0 }
  0xcb   : > { %261 = vst.msk [vmem:[%s638_s19 + $0x50] sm:$0xff] %vm250_vm0, %v212_v12 }
  0xce   : > { %v213_v13 = vpop.trf.xlu0 }
  0xcf   : > { %262 = vst.msk [vmem:[%s638_s19 + $0x58] sm:$0xff] %vm250_vm0, %v213_v13 }
  0xd2   : > { %v214_v14 = vpop.trf.xlu0 }
  0xd3   : > { %263 = vst.msk [vmem:[%s638_s19 + $0x60] sm:$0xff] %vm250_vm0, %v214_v14 }
  0xd6   : > { %v215_v15 = vpop.trf.xlu0 }
  0xd7   : > { %264 = vst.msk [vmem:[%s638_s19 + $0x68] sm:$0xff] %vm250_vm0, %v215_v15 }
  0xda   : > { %v216_v16 = vpop.trf.xlu0 }
  0xdb   : > { %265 = vst.msk [vmem:[%s638_s19 + $0x70] sm:$0xff] %vm250_vm0, %v216_v16 }
  0xde   : > { %v217_v17 = vpop.trf.xlu0 }
  0xdf   : > { %266 = vst.msk [vmem:[%s638_s19 + $0x78] sm:$0xff] %vm250_vm0, %v217_v17 }
  0xe2   : > { %v234_v18 = vpop.trf.xlu0 }
  0xe3   : > { %267 = vst.msk [vmem:[%s638_s19 + $0x80] sm:$0xff] %vm250_vm0, %v234_v18 }
  0xe6   : > { %v235_v19 = vpop.trf.xlu0 }
  0xe7   : > { %268 = vst.msk [vmem:[%s638_s19 + $0x88] sm:$0xff] %vm250_vm0, %v235_v19 }
  0xea   : > { %v236_v20 = vpop.trf.xlu0 }
  0xeb   : > { %269 = vst.msk [vmem:[%s638_s19 + $0x90] sm:$0xff] %vm250_vm0, %v236_v20 }
  0xee   : > { %v237_v21 = vpop.trf.xlu0 }
  0xef   : > { %270 = vst.msk [vmem:[%s638_s19 + $0x98] sm:$0xff] %vm250_vm0, %v237_v21 }
  0xf2   : > { %v238_v22 = vpop.trf.xlu0 }
  0xf3   : > { %271 = vst.msk [vmem:[%s638_s19 + $0xa0] sm:$0xff] %vm250_vm0, %v238_v22 }
  0xf6   : > { %v239_v23 = vpop.trf.xlu0 }
  0xf7   : > { %272 = vst.msk [vmem:[%s638_s19 + $0xa8] sm:$0xff] %vm250_vm0, %v239_v23 }
  0xfa   : > { %v240_v24 = vpop.trf.xlu0 }
  0xfb   : > { %273 = vst.msk [vmem:[%s638_s19 + $0xb0] sm:$0xff] %vm250_vm0, %v240_v24 }
  0xfe   : > { %v241_v25 = vpop.trf.xlu0 }
  0xff   : > { %274 = vst.msk [vmem:[%s638_s19 + $0xb8] sm:$0xff] %vm250_vm0, %v241_v25 }
 0x102   : > { %v242_v26 = vpop.trf.xlu0 }
 0x103   : > { %275 = vst.msk [vmem:[%s638_s19 + $0xc0] sm:$0xff] %vm250_vm0, %v242_v26 }
 0x106   : > { %v243_v27 = vpop.trf.xlu0 }
 0x107   : > { %276 = vst.msk [vmem:[%s638_s19 + $0xc8] sm:$0xff] %vm250_vm0, %v243_v27 }
 0x10a   : > { %v244_v28 = vpop.trf.xlu0 }
 0x10b   : > { %277 = vst.msk [vmem:[%s638_s19 + $0xd0] sm:$0xff] %vm250_vm0, %v244_v28 }
 0x10e   : > { %v245_v29 = vpop.trf.xlu0 }
 0x10f   : > { %278 = vst.msk [vmem:[%s638_s19 + $0xd8] sm:$0xff] %vm250_vm0, %v245_v29 }
 0x112   : > { %v246_v30 = vpop.trf.xlu0 }
 0x113   : > { %279 = vst.msk [vmem:[%s638_s19 + $0xe0] sm:$0xff] %vm250_vm0, %v246_v30 }
 0x116   : > { %v247_v31 = vpop.trf.xlu0 }
 0x117   : > { %280 = vst.msk [vmem:[%s638_s19 + $0xe8] sm:$0xff] %vm250_vm0, %v247_v31 }
 0x11a   : > { %v248_v32 = vpop.trf.xlu0 }
 0x11b   : > { %281 = vst.msk [vmem:[%s638_s19 + $0xf0] sm:$0xff] %vm250_vm0, %v248_v32 }
 0x11e   : > { %v249_v33 = vpop.trf.xlu0 }
 0x11f   : > { %282 = vst.msk [vmem:[%s638_s19 + $0xf8] sm:$0xff] %vm250_vm0, %v249_v33 }
 0x120 PF: > { %s14_s11 = sadd.s32 1, %s543_s11   ;;  %s727_s6 = smov %s527_s7 }
 0x121   : > { %p11_p7 = scmp.ge.s32.totalorder %s14_s11, 4   ;;  %s728_s7 = smov %s531_s8 }
 0x122   : > { %s729_s8 = smov %s605_s18  ;;  %s730_s9 = smov %s539_s10 }
 0x123   : > { %s731_s10 = smov %s733_s13  ;;  %13 = sbr.rel (!%p11_p7) target bundleno = 4 (0x4), region = 64 }
 0x128   :  { %319 = vsyncpa [#allocation3], 1 }
 0x129   :  { %321 = vsyncpa [#allocation3 + $0x1], 1 }

</bundles_post_ra>
